<compile_context>
chip_gen: v5e
topology: v5e:2x2
jax: 0.10.0
libtpu: 0.0.40
codegen_flags: <defaults>
</compile_context>

<pallas_src>
import numpy as np
import jax
import jax.numpy as jnp
from jax.experimental import pallas as pl
from jax.experimental.pallas import tpu as pltpu


# Clamp applied to logits before the shared tanh.  It keeps the folded 1e6
# "stop" logit finite through softplus(g) = -log(0.5 - 0.5*tanh(0.5*g))
# (f32 tanh saturates to exactly 1.0 near |z| ~ 9, which would give
# log(0) = -inf and then inf * 0 = NaN inside the triangular matmul).
# sigmoid(12) differs from 1 by ~6e-6, so the clamp is invisible at the output.
_LOGIT_CLAMP = 12.0


def crl_kernel(x_ref, w1_ref, b1_ref, w2_ref, b2_ref, w3_ref, b3_ref,
               w4_ref, b4_ref, lt_ref, out_ref):
    """One batch tile.  Activations are (features, TN): batch on the lane axis."""
    cdt = w1_ref.dtype                       # MXU compute dtype (bf16 or f32)

    def dense(w_ref, b_ref, a):
        # (out, in) @ (in, TN) on the MXU, f32 accumulate, f32 bias add.
        z = jnp.dot(w_ref[...], a.astype(cdt), preferred_element_type=jnp.float32)
        return z + b_ref[...]

    def sigmoid(z):
        # Single EUP op (tanh) instead of exp + reciprocal; exact.
        return 0.5 * jnp.tanh(0.5 * z) + 0.5

    x = x_ref[...]                            # (d, TN)
    h = sigmoid(dense(w1_ref, b1_ref, x))     # (M, TN)
    h = sigmoid(dense(w2_ref, b2_ref, h))     # (M, TN)
    h = sigmoid(dense(w3_ref, b3_ref, h))     # (M, TN)
    g = dense(w4_ref, b4_ref, h)              # (K, TN); last row is the 1e6 pad

    gc = jnp.minimum(g, _LOGIT_CLAMP)         # see _LOGIT_CLAMP note
    t = jnp.tanh(0.5 * gc)                    # one EUP tanh, shared below
    sig = 0.5 * t + 0.5                       # sigmoid(g)   (pad row ~= 1)

    # softplus(g) = -log(sigmoid(-g)) = -log(0.5 - 0.5*t); finite thanks to clamp.
    softplus_g = -jnp.log(0.5 - 0.5 * t)      # (K, TN)

    # Exclusive cumulative product of sigmoid(-g) down the class axis:
    #   excl[k, n] = prod_{j<k} sigmoid(-g[j, n]) = exp(-sum_{j<k} softplus(g[j, n]))
    # as one small (K,K)@(K,TN) MXU matmul with lt[k, j] = 1 iff j < k.  The
    # pad row of softplus_g only meets lt's zero column, so it never contributes.
    excl = jnp.exp(-jnp.dot(lt_ref[...], softplus_g,
                            preferred_element_type=jnp.float32))

    out_ref[...] = sig * excl                 # lane-dense (K, TN) store


def _round_up(v, m):
    return -(-v // m) * m


def _choose_batch_tile(n, tile_n):
    """Lane-dim batch tile: a multiple of 128 (or the whole batch), and at
    least two grid steps when possible so the 'parallel' axis can shard
    across the two v7x TensorCores."""
    if n <= 256:
        return n                              # one block == full dim (always legal)
    tn = min(tile_n, _round_up(pl.cdiv(n, 2), 128))
    return max(128, (tn // 128) * 128)


def crl_forward(x, params, *, tile_n=2048, matmul_dtype=jnp.bfloat16):
    """x: (N, d) f32; params in PyTorch-native (out, in) layout (init_params).
    Returns (N, K) f32 probabilities, matching CRL.forward."""
    w1, b1, w2, b2, w3, b3, w4p, b4p = params
    N, d = x.shape
    M = w1.shape[0]
    K = w4p.shape[0]

    # Transposed, lane-dense compute layout: batch rides the 128-lane axis.
    x_t = x.T.astype(matmul_dtype)                        # (d, N)
    w1c, w2c, w3c, w4c = (w.astype(matmul_dtype) for w in (w1, w2, w3, w4p))

    # lt[k, j] = 1 iff j < k  (strictly lower triangular ones).
    lt = (jnp.arange(K)[:, None] > jnp.arange(K)[None, :]).astype(jnp.float32)

    tn = _choose_batch_tile(N, tile_n)
    grid = (pl.cdiv(N, tn),)

    const = lambda i: (0, 0)
    in_specs = [
        pl.BlockSpec((d, tn), lambda i: (0, i)),   # x: tiled over batch (lanes)
        pl.BlockSpec((M, d), const),               # w1 (VMEM-resident, constant idx)
        pl.BlockSpec((M, 1), const),               # b1
        pl.BlockSpec((M, M), const),               # w2
        pl.BlockSpec((M, 1), const),               # b2
        pl.BlockSpec((M, M), const),               # w3
        pl.BlockSpec((M, 1), const),               # b3
        pl.BlockSpec((K, M), const),               # w4 (padded with zero row)
        pl.BlockSpec((K, 1), const),               # b4 (padded with 1e6)
        pl.BlockSpec((K, K), const),               # lt (strict lower-tri ones)
    ]
    out_spec = pl.BlockSpec((K, tn), lambda i: (0, i))

    operands = (x_t, w1c, b1, w2c, b2, w3c, b3, w4c, b4p, lt)
    in_bytes = sum(int(a.size) * a.dtype.itemsize for a in operands)
    cost = pl.CostEstimate(
        flops=2 * N * (d * M + 2 * M * M + M * K + K * K),
        transcendentals=N * (3 * M + 3 * K),
        bytes_accessed=in_bytes + N * K * 4,
    )

    out_kn = pl.pallas_call(
        crl_kernel,
        out_shape=jax.ShapeDtypeStruct((K, N), jnp.float32),
        grid_spec=pltpu.PrefetchScalarGridSpec(
            num_scalar_prefetch=0,
            grid=grid,
            in_specs=in_specs,
            out_specs=out_spec,
        ),
        compiler_params=pltpu.CompilerParams(
            dimension_semantics=("parallel",),
            vmem_limit_bytes=32 * 1024 * 1024,
        ),
        cost_estimate=cost,
    )(*operands)

    return out_kn.T                                      # (N, K), like PyTorch


def init_params(key, d, M, K):
    """Deterministic params matching CRL.__init__ shapes (std=0.1 normals).

    Weights are PyTorch-native (out, in).  The 4th linear is padded from
    (K-1, M) to (K, M) with a zero row, and its bias from (K-1, 1) to (K, 1)
    with a 1e6 entry, emulating the torch.cat of the 1e6 column."""
    ks = jax.random.split(key, 8)
    std = 0.1
    w1 = std * jax.random.normal(ks[0], (M, d), jnp.float32)
    b1 = std * jax.random.normal(ks[1], (M, 1), jnp.float32)
    w2 = std * jax.random.normal(ks[2], (M, M), jnp.float32)
    b2 = std * jax.random.normal(ks[3], (M, 1), jnp.float32)
    w3 = std * jax.random.normal(ks[4], (M, M), jnp.float32)
    b3 = std * jax.random.normal(ks[5], (M, 1), jnp.float32)
    w4 = std * jax.random.normal(ks[6], (K - 1, M), jnp.float32)
    b4 = std * jax.random.normal(ks[7], (K - 1, 1), jnp.float32)
    w4p = jnp.concatenate([w4, jnp.zeros((1, M), jnp.float32)], axis=0)
    b4p = jnp.concatenate([b4, jnp.full((1, 1), 1.0e6, jnp.float32)], axis=0)
    return (w1, b1, w2, b2, w3, b3, w4p, b4p)


def crl_reference(x, params):
    """Pure-numpy float64 reference mirroring the PyTorch forward loop exactly."""
    w1, b1, w2, b2, w3, b3, w4p, b4p = [np.asarray(p, np.float64) for p in params]
    sg = lambda z: 1.0 / (1.0 + np.exp(-z))
    xn = np.asarray(x, np.float64)
    h = sg(xn @ w1.T + b1.T)
    h = sg(h @ w2.T + b2.T)
    h = sg(h @ w3.T + b3.T)
    g = h @ w4p.T + b4p.T                  # (N, K); last column is 1e6
    N, K = g.shape
    pro = np.ones((N, K), np.float64)
    for k in range(K):
        for j in range(k):
            pro[:, k] *= sg(-g[:, j])
        pro[:, k] *= sg(g[:, k])
    return pro.astype(np.float32)


if __name__ == "__main__":
    d, M, K = 16, 32, 8
    N = 1024          # -> two grid steps of TN=512 (pipelining + both v7x TCs)

    key = jax.random.PRNGKey(0)
    kx, kp = jax.random.split(key)
    x = jax.random.normal(kx, (N, d), jnp.float32)
    params = init_params(kp, d, M, K)

    ref = crl_reference(x, params)

    # f32 MXU path: the tanh-based sigmoid is exact, so agreement is tight.
    out_f32 = jax.block_until_ready(crl_forward(x, params, matmul_dtype=jnp.float32))
    np.testing.assert_allclose(np.asarray(out_f32), ref, rtol=1e-3, atol=1e-4)

    # Default bf16 MXU path: bf16 inputs/weights on the MXU, f32 accumulate and
    # f32 element-wise math.  Outputs are probabilities in [0, 1], so an
    # absolute 5e-3 check bounds the bf16 rounding of the matmul inputs.
    out = jax.block_until_ready(crl_forward(x, params))
    np.testing.assert_allclose(np.asarray(out), ref, rtol=0.0, atol=5e-3)

    print("KERNEL_OK")
</pallas_src>

<mosaic_0001>
module attributes {stable_mosaic.version = 11 : i64} {
  func.func @crl_kernel(%arg0: i32, %arg1: memref<16x512xf32, #tpu.memory_space<vmem>>, %arg2: memref<32x16xf32, #tpu.memory_space<vmem>>, %arg3: memref<32x1xf32, #tpu.memory_space<vmem>>, %arg4: memref<32x32xf32, #tpu.memory_space<vmem>>, %arg5: memref<32x1xf32, #tpu.memory_space<vmem>>, %arg6: memref<32x32xf32, #tpu.memory_space<vmem>>, %arg7: memref<32x1xf32, #tpu.memory_space<vmem>>, %arg8: memref<8x32xf32, #tpu.memory_space<vmem>>, %arg9: memref<8x1xf32, #tpu.memory_space<vmem>>, %arg10: memref<8x8xf32, #tpu.memory_space<vmem>>, %arg11: memref<8x512xf32, #tpu.memory_space<vmem>>) attributes {dimension_semantics = [#tpu.dimension_semantics<parallel>], iteration_bounds = array<i64: 2>, scalar_prefetch = 0 : i64, scratch_operands = 0 : i64, tpu.core_type = #tpu.core_type<tc>, window_params = [{transform_indices = @transform_0, window_bounds = array<i64: 16, 512>}, {pipeline_mode = #tpu.pipeline_mode<synchronous>, transform_indices = @transform_1, window_bounds = array<i64: 32, 16>}, {pipeline_mode = #tpu.pipeline_mode<synchronous>, transform_indices = @transform_2, window_bounds = array<i64: 32, 1>}, {pipeline_mode = #tpu.pipeline_mode<synchronous>, transform_indices = @transform_3, window_bounds = array<i64: 32, 32>}, {pipeline_mode = #tpu.pipeline_mode<synchronous>, transform_indices = @transform_4, window_bounds = array<i64: 32, 1>}, {pipeline_mode = #tpu.pipeline_mode<synchronous>, transform_indices = @transform_5, window_bounds = array<i64: 32, 32>}, {pipeline_mode = #tpu.pipeline_mode<synchronous>, transform_indices = @transform_6, window_bounds = array<i64: 32, 1>}, {pipeline_mode = #tpu.pipeline_mode<synchronous>, transform_indices = @transform_7, window_bounds = array<i64: 8, 32>}, {pipeline_mode = #tpu.pipeline_mode<synchronous>, transform_indices = @transform_8, window_bounds = array<i64: 8, 1>}, {pipeline_mode = #tpu.pipeline_mode<synchronous>, transform_indices = @transform_9, window_bounds = array<i64: 8, 8>}, {transform_indices = @transform_10, window_bounds = array<i64: 8, 512>}]} {
    %c0 = arith.constant 0 : index
    %c0_0 = arith.constant 0 : index
    %0 = vector.load %arg1[%c0, %c0_0] : memref<16x512xf32, #tpu.memory_space<vmem>>, vector<16x512xf32>
    %c0_1 = arith.constant 0 : index
    %c0_2 = arith.constant 0 : index
    %1 = vector.load %arg2[%c0_1, %c0_2] : memref<32x16xf32, #tpu.memory_space<vmem>>, vector<32x16xf32>
    %cst = arith.constant dense<0.000000e+00> : vector<32x512xf32>
    %2 = tpu.matmul %1, %0, %cst {dimension_numbers = #tpu.dot_dimension_numbers<[1], [0], [0], [1], [0, 0, 1, 1], [], []>} : vector<32x16xf32>, vector<16x512xf32>, vector<32x512xf32> -> vector<32x512xf32>
    %c0_3 = arith.constant 0 : index
    %c0_4 = arith.constant 0 : index
    %3 = vector.load %arg3[%c0_3, %c0_4] : memref<32x1xf32, #tpu.memory_space<vmem>>, vector<32x1xf32>
    %4 = vector.broadcast %3 : vector<32x1xf32> to vector<32x512xf32>
    %5 = arith.addf %2, %4 : vector<32x512xf32>
    %cst_5 = arith.constant 5.000000e-01 : f32
    %6 = vector.broadcast %cst_5 : f32 to vector<32x512xf32>
    %7 = arith.mulf %6, %5 : vector<32x512xf32>
    %8 = math.tanh %7 : vector<32x512xf32>
    %cst_6 = arith.constant 5.000000e-01 : f32
    %9 = vector.broadcast %cst_6 : f32 to vector<32x512xf32>
    %10 = arith.mulf %9, %8 : vector<32x512xf32>
    %cst_7 = arith.constant 5.000000e-01 : f32
    %11 = vector.broadcast %cst_7 : f32 to vector<32x512xf32>
    %12 = arith.addf %10, %11 : vector<32x512xf32>
    %c0_8 = arith.constant 0 : index
    %c0_9 = arith.constant 0 : index
    %13 = vector.load %arg4[%c0_8, %c0_9] : memref<32x32xf32, #tpu.memory_space<vmem>>, vector<32x32xf32>
    %cst_10 = arith.constant dense<0.000000e+00> : vector<32x512xf32>
    %14 = tpu.matmul %13, %12, %cst_10 {dimension_numbers = #tpu.dot_dimension_numbers<[1], [0], [0], [1], [0, 0, 1, 1], [], []>} : vector<32x32xf32>, vector<32x512xf32>, vector<32x512xf32> -> vector<32x512xf32>
    %c0_11 = arith.constant 0 : index
    %c0_12 = arith.constant 0 : index
    %15 = vector.load %arg5[%c0_11, %c0_12] : memref<32x1xf32, #tpu.memory_space<vmem>>, vector<32x1xf32>
    %16 = vector.broadcast %15 : vector<32x1xf32> to vector<32x512xf32>
    %17 = arith.addf %14, %16 : vector<32x512xf32>
    %cst_13 = arith.constant 5.000000e-01 : f32
    %18 = vector.broadcast %cst_13 : f32 to vector<32x512xf32>
    %19 = arith.mulf %18, %17 : vector<32x512xf32>
    %20 = math.tanh %19 : vector<32x512xf32>
    %cst_14 = arith.constant 5.000000e-01 : f32
    %21 = vector.broadcast %cst_14 : f32 to vector<32x512xf32>
    %22 = arith.mulf %21, %20 : vector<32x512xf32>
    %cst_15 = arith.constant 5.000000e-01 : f32
    %23 = vector.broadcast %cst_15 : f32 to vector<32x512xf32>
    %24 = arith.addf %22, %23 : vector<32x512xf32>
    %c0_16 = arith.constant 0 : index
    %c0_17 = arith.constant 0 : index
    %25 = vector.load %arg6[%c0_16, %c0_17] : memref<32x32xf32, #tpu.memory_space<vmem>>, vector<32x32xf32>
    %cst_18 = arith.constant dense<0.000000e+00> : vector<32x512xf32>
    %26 = tpu.matmul %25, %24, %cst_18 {dimension_numbers = #tpu.dot_dimension_numbers<[1], [0], [0], [1], [0, 0, 1, 1], [], []>} : vector<32x32xf32>, vector<32x512xf32>, vector<32x512xf32> -> vector<32x512xf32>
    %c0_19 = arith.constant 0 : index
    %c0_20 = arith.constant 0 : index
    %27 = vector.load %arg7[%c0_19, %c0_20] : memref<32x1xf32, #tpu.memory_space<vmem>>, vector<32x1xf32>
    %28 = vector.broadcast %27 : vector<32x1xf32> to vector<32x512xf32>
    %29 = arith.addf %26, %28 : vector<32x512xf32>
    %cst_21 = arith.constant 5.000000e-01 : f32
    %30 = vector.broadcast %cst_21 : f32 to vector<32x512xf32>
    %31 = arith.mulf %30, %29 : vector<32x512xf32>
    %32 = math.tanh %31 : vector<32x512xf32>
    %cst_22 = arith.constant 5.000000e-01 : f32
    %33 = vector.broadcast %cst_22 : f32 to vector<32x512xf32>
    %34 = arith.mulf %33, %32 : vector<32x512xf32>
    %cst_23 = arith.constant 5.000000e-01 : f32
    %35 = vector.broadcast %cst_23 : f32 to vector<32x512xf32>
    %36 = arith.addf %34, %35 : vector<32x512xf32>
    %c0_24 = arith.constant 0 : index
    %c0_25 = arith.constant 0 : index
    %37 = vector.load %arg8[%c0_24, %c0_25] : memref<8x32xf32, #tpu.memory_space<vmem>>, vector<8x32xf32>
    %cst_26 = arith.constant dense<0.000000e+00> : vector<8x512xf32>
    %38 = tpu.matmul %37, %36, %cst_26 {dimension_numbers = #tpu.dot_dimension_numbers<[1], [0], [0], [1], [0, 0, 1, 1], [], []>} : vector<8x32xf32>, vector<32x512xf32>, vector<8x512xf32> -> vector<8x512xf32>
    %c0_27 = arith.constant 0 : index
    %c0_28 = arith.constant 0 : index
    %39 = vector.load %arg9[%c0_27, %c0_28] : memref<8x1xf32, #tpu.memory_space<vmem>>, vector<8x1xf32>
    %40 = vector.broadcast %39 : vector<8x1xf32> to vector<8x512xf32>
    %41 = arith.addf %38, %40 : vector<8x512xf32>
    %cst_29 = arith.constant 1.200000e+01 : f32
    %42 = vector.broadcast %cst_29 : f32 to vector<8x512xf32>
    %43 = arith.minimumf %41, %42 : vector<8x512xf32>
    %cst_30 = arith.constant 5.000000e-01 : f32
    %44 = vector.broadcast %cst_30 : f32 to vector<8x512xf32>
    %45 = arith.mulf %44, %43 : vector<8x512xf32>
    %46 = math.tanh %45 : vector<8x512xf32>
    %cst_31 = arith.constant 5.000000e-01 : f32
    %47 = vector.broadcast %cst_31 : f32 to vector<8x512xf32>
    %48 = arith.mulf %47, %46 : vector<8x512xf32>
    %cst_32 = arith.constant 5.000000e-01 : f32
    %49 = vector.broadcast %cst_32 : f32 to vector<8x512xf32>
    %50 = arith.addf %48, %49 : vector<8x512xf32>
    %cst_33 = arith.constant 5.000000e-01 : f32
    %51 = vector.broadcast %cst_33 : f32 to vector<8x512xf32>
    %52 = arith.mulf %51, %46 : vector<8x512xf32>
    %cst_34 = arith.constant 5.000000e-01 : f32
    %53 = vector.broadcast %cst_34 : f32 to vector<8x512xf32>
    %54 = arith.subf %53, %52 : vector<8x512xf32>
    %55 = math.log %54 : vector<8x512xf32>
    %cst_35 = arith.constant 0.000000e+00 : f32
    %56 = vector.broadcast %cst_35 : f32 to vector<8x512xf32>
    %57 = arith.subf %56, %55 : vector<8x512xf32>
    %c0_36 = arith.constant 0 : index
    %c0_37 = arith.constant 0 : index
    %58 = vector.load %arg10[%c0_36, %c0_37] : memref<8x8xf32, #tpu.memory_space<vmem>>, vector<8x8xf32>
    %cst_38 = arith.constant dense<0.000000e+00> : vector<8x512xf32>
    %59 = tpu.matmul %58, %57, %cst_38 {dimension_numbers = #tpu.dot_dimension_numbers<[1], [0], [0], [1], [0, 0, 1, 1], [], []>} : vector<8x8xf32>, vector<8x512xf32>, vector<8x512xf32> -> vector<8x512xf32>
    %cst_39 = arith.constant 0.000000e+00 : f32
    %60 = vector.broadcast %cst_39 : f32 to vector<8x512xf32>
    %61 = arith.subf %60, %59 : vector<8x512xf32>
    %62 = math.exp %61 : vector<8x512xf32>
    %63 = arith.mulf %50, %62 : vector<8x512xf32>
    %c0_40 = arith.constant 0 : index
    %c0_41 = arith.constant 0 : index
    %64 = vector.load %arg11[%c0_40, %c0_41] : memref<8x512xf32, #tpu.memory_space<vmem>>, vector<8x512xf32>
    tpu.vector_store %arg11[%c0_40, %c0_41], %63 {strides = array<i32>} : memref<8x512xf32, #tpu.memory_space<vmem>>, vector<8x512xf32>,
    return
  }
  func.func @transform_0(%arg0: i32) -> (i32, i32) {
    %c0_i32 = arith.constant 0 : i32
    %c0_i32_0 = arith.constant 0 : i32
    return %c0_i32, %arg0 : i32, i32
  }
  func.func @transform_1(%arg0: i32) -> (i32, i32) {
    %c0_i32 = arith.constant 0 : i32
    %c0_i32_0 = arith.constant 0 : i32
    %c0_i32_1 = arith.constant 0 : i32
    return %c0_i32, %c0_i32_0 : i32, i32
  }
  func.func @transform_2(%arg0: i32) -> (i32, i32) {
    %c0_i32 = arith.constant 0 : i32
    %c0_i32_0 = arith.constant 0 : i32
    %c0_i32_1 = arith.constant 0 : i32
    return %c0_i32, %c0_i32_0 : i32, i32
  }
  func.func @transform_3(%arg0: i32) -> (i32, i32) {
    %c0_i32 = arith.constant 0 : i32
    %c0_i32_0 = arith.constant 0 : i32
    %c0_i32_1 = arith.constant 0 : i32
    return %c0_i32, %c0_i32_0 : i32, i32
  }
  func.func @transform_4(%arg0: i32) -> (i32, i32) {
    %c0_i32 = arith.constant 0 : i32
    %c0_i32_0 = arith.constant 0 : i32
    %c0_i32_1 = arith.constant 0 : i32
    return %c0_i32, %c0_i32_0 : i32, i32
  }
  func.func @transform_5(%arg0: i32) -> (i32, i32) {
    %c0_i32 = arith.constant 0 : i32
    %c0_i32_0 = arith.constant 0 : i32
    %c0_i32_1 = arith.constant 0 : i32
    return %c0_i32, %c0_i32_0 : i32, i32
  }
  func.func @transform_6(%arg0: i32) -> (i32, i32) {
    %c0_i32 = arith.constant 0 : i32
    %c0_i32_0 = arith.constant 0 : i32
    %c0_i32_1 = arith.constant 0 : i32
    return %c0_i32, %c0_i32_0 : i32, i32
  }
  func.func @transform_7(%arg0: i32) -> (i32, i32) {
    %c0_i32 = arith.constant 0 : i32
    %c0_i32_0 = arith.constant 0 : i32
    %c0_i32_1 = arith.constant 0 : i32
    return %c0_i32, %c0_i32_0 : i32, i32
  }
  func.func @transform_8(%arg0: i32) -> (i32, i32) {
    %c0_i32 = arith.constant 0 : i32
    %c0_i32_0 = arith.constant 0 : i32
    %c0_i32_1 = arith.constant 0 : i32
    return %c0_i32, %c0_i32_0 : i32, i32
  }
  func.func @transform_9(%arg0: i32) -> (i32, i32) {
    %c0_i32 = arith.constant 0 : i32
    %c0_i32_0 = arith.constant 0 : i32
    %c0_i32_1 = arith.constant 0 : i32
    return %c0_i32, %c0_i32_0 : i32, i32
  }
  func.func @transform_10(%arg0: i32) -> (i32, i32) {
    %c0_i32 = arith.constant 0 : i32
    %c0_i32_0 = arith.constant 0 : i32
    return %c0_i32, %arg0 : i32, i32
  }
}

</mosaic_0001>

<bundles_post_ra>
// kernel: tpu_custom_call.1
= control target key start
LH: loop header
LB: loop body
LE: loop exit
PB: predicated region body
PF: predicated region fallthrough
CT: control target
= control target key end

     0   :  { %s2138_s0 = inlined_call_operand.vmem [shape: f32[16,1024], index: 0, kind: input, shape index: {}]   ;;  %s2139_s1 = inlined_call_operand.vmem [shape: f32[32,16], index: 1, kind: input, shape index: {}]   ;;  %s2140_s2 = inlined_call_operand.vmem [shape: f32[32,1], index: 2, kind: input, shape index: {}]   ;;  %s2141_s3 = inlined_call_operand.hbm [shape: f32[32,32], index: 3, kind: input, shape index: {}]   ;;  %s2142_s4 = inlined_call_operand.vmem [shape: f32[32,1], index: 4, kind: input, shape index: {}]   ;;  %s2143_s5 = inlined_call_operand.hbm [shape: f32[32,32], index: 5, kind: input, shape index: {}]   ;;  %s2144_s6 = inlined_call_operand.vmem [shape: f32[32,1], index: 6, kind: input, shape index: {}]   ;;  %s2145_s7 = inlined_call_operand.vmem [shape: f32[8,32], index: 7, kind: input, shape index: {}]   ;;  %s2146_s8 = inlined_call_operand.vmem [shape: f32[8,1], index: 8, kind: input, shape index: {}]   ;;  %s2147_s9 = inlined_call_operand.vmem [shape: f32[8,8], index: 9, kind: input, shape index: {}]   ;;  %s2148_s10 = inlined_call_operand.hbm [shape: f32[8,1024], index: 10, kind: output, shape index: {}]  }
   0x1   :  { %2151 = sst [smem:[#allocation14_spill]] %s2141_s3 }
   0x2   :  { %15 = vsyncpa [#allocation4], 0 }
   0x3   :  { %16 = vsyncpa [#allocation7], 0 }
   0x4   :  { %17 = vsyncpa [#allocation5], 0 }
   0x5   :  { %19 = vsyncpa [#allocation5 + $0x1], 0  ;;  %s1887_s13 = smov 0   ;;  %s1889_s14 = smov 0  }
   0x6   :  { %s1891_s15 = smov 0   ;;  %s1893_s16 = smov 0  }
   0x7 LB: > { %s1908_s17 = sadd.s32 4294967295, %s1825_s16   ;;  %s1433_s18 = sadd.s32 4294967294, %s1825_s16   ;;  %s1825_s16 = sphi %s1893_s16, %s2159_s16   ;;  %s1821_s15 = sphi %s1891_s15, %s2163_s15   ;;  %s1817_s14 = sphi %s1889_s14, %s2162_s14   ;;  %s1813_s13 = sphi %s1887_s13, %s2161_s13  }
   0x8   : > { %s1912_s19 = sadd.s32 1, %s1825_s16   ;;  %s32_s20 = sadd.s32 1, %s1821_s15 }
   0x9   : > { %2152 = sst [smem:[#allocation12_spill]] %s1912_s19  ;;  %s29_s21 = ssub.s32 %s1825_s16, %s1912_s19 }
   0xa   : > { %p39_p0 = scmp.ne.s32.totalorder %s1821_s15, %s1817_s14  ;;  %p30_p1 = scmp.eq.s32.totalorder %s29_s21, 0 }
   0xb   : > { %p40_p2 = scmp.eq.s32.totalorder %s1825_s16, 0  ;;  %p258_p3 = scmp.eq.s32.totalorder %s1908_s17, 1 }
   0xc   : > { %p263_p4 = scmp.ne.s32.totalorder %s1817_s14, %s1813_s13  ;;  %p264_p7 = scmp.eq.s32.totalorder %s1433_s18, 1 }
   0xd   : > { %s1924_s22 = scalar_select %p30_p1, %s1821_s15, %s32_s20  }
   0xe   : > { %p1926_p5 = por %p40_p2, %p39_p0  ;;  %p1930_p6 = por %p258_p3, %p39_p0 }
   0xf   : > { %2153 = sst [smem:[#allocation13_spill]] %s1924_s22  ;;  %p1434_p8 = scmp.ge.s32.totalorder %s1825_s16, 1 }
  0x10   : > { %p271_p9 = scmp.lt.s32.totalorder %s1825_s16, 3  ;;  %p1936_p10 = por %p264_p7, %p263_p4 }
  0x11   : > { %p1530_p11 = scmp.eq.s32.totalorder %s1908_s17, 0  ;;  %s2158_s3 = sld [smem:[#allocation14_spill]] }
  0x12   : > { %p1941_p12 = pnand %p1434_p8, %p271_p9  ;;  %s1827_s30 = smov [#allocation3]  }
  0x13   : > { %s290_s11 = sshll.u32 %s1827_s30, 4  ;;  %s305_s20 = sshll.u32 %s2143_s5, 4  ;;  %s291_s11 = int_to_ptr.vmem [resolvable:$true] %s290_s11  ;;  %s306_s20 = int_to_ptr.hbm [resolvable:$true] %s305_s20 }
  0x14   : > { %p1519_p13 = pneg %p1941_p12  ;;  %s1828_s21 = smov 128  }
  0x15   : > { %s1829_s22 = smov 8   ;;  %s1830_s19 = smov [#allocation6]  }
  0x16   : > { %p1520_p0 = pnand %p1530_p11, %p1519_p13  ;;  %s307_s27 = sshll.u32 %s1830_s19, 4  ;;  %s308_s27 = int_to_ptr.vmem [resolvable:$true] %s307_s27 }
  0x17   : > { %s288_s29 = sshll.u32 %s2158_s3, 4  ;;  %p1437_p1 = scmp.ge.s32.totalorder %s1825_s16, 2  ;;  %s289_s29 = int_to_ptr.hbm [resolvable:$true] %s288_s29 }
  0x18   : > { %1522 = dma.hbm_to_vmem [thread:$0]  (!%p1520_p0), %s289_s29, 512, %s291_s11, [#allocation4], %s1828_s21, %s1828_s21, %s1829_s22  }
  0x19   : > { %1525 = dma.hbm_to_vmem [thread:$0]  (!%p1520_p0), %s306_s20, 512, %s308_s27, [#allocation7], %s1828_s21, %s1828_s21, %s1829_s22  }
  0x1a   : > { %329 = sbr.rel (%p1437_p1) target bundleno = 43 (0x2b), region = 52 }
  0x1f   : > { %332 = sbr.rel (!%p1926_p5) target bundleno = 43 (0x2b), region = 56  ;;  %s334_s28 = sand.u32 (%p1926_p5), 1, %s1821_s15  }
  0x20   : > { %s1507_s30 = sshll.u32 (%p1926_p5), %s1825_s16, 5  ;;  %s1438_s12 = sshll.u32 (%p1926_p5), %s334_s28, 6 }
  0x21   : > { %s339_s29 = scalar_lea.vmem (%p1926_p5), %s2138_s0, %s1507_s30  ;;  %s336_s19 = scalar_lea.vmem (%p1926_p5), [#allocation2], %s1438_s12 }
  0x22   : > { %v352_v0 = vld [vmem:[%s339_s29] sm:$0xff] (%p1926_p5)  ;;  %v354_v1 = vld [vmem:[%s339_s29 + $0x8] sm:$0xff] (%p1926_p5)  ;;  %v356_v2 = vld [vmem:[%s339_s29 + $0x10] sm:$0xff] (%p1926_p5) }
  0x23   : > { %353 = vst [vmem:[%s336_s19] sm:$0xff] (%p1926_p5), %v352_v0  ;;  %v358_v3 = vld [vmem:[%s339_s29 + $0x18] sm:$0xff] (%p1926_p5)  ;;  %v360_v4 = vld [vmem:[%s339_s29 + $0x40] sm:$0xff] (%p1926_p5)  ;;  %v362_v5 = vld [vmem:[%s339_s29 + $0x48] sm:$0xff] (%p1926_p5) }
  0x24   : > { %355 = vst [vmem:[%s336_s19 + $0x8] sm:$0xff] %v354_v1  ;;  %v364_v6 = vld [vmem:[%s339_s29 + $0x50] sm:$0xff]  ;;  %v366_v7 = vld [vmem:[%s339_s29 + $0x58] sm:$0xff] }
  0x25   : > { %357 = vst [vmem:[%s336_s19 + $0x10] sm:$0xff] %v356_v2 }
  0x26   : > { %359 = vst [vmem:[%s336_s19 + $0x18] sm:$0xff] %v358_v3 }
  0x27   : > { %361 = vst [vmem:[%s336_s19 + $0x20] sm:$0xff] %v360_v4 }
  0x28   : > { %363 = vst [vmem:[%s336_s19 + $0x28] sm:$0xff] %v362_v5 }
  0x29   : > { %365 = vst [vmem:[%s336_s19 + $0x30] sm:$0xff] %v364_v6 }
  0x2a   : > { %367 = vst [vmem:[%s336_s19 + $0x38] sm:$0xff] %v366_v7 }
  0x2b PF: > { %376 = sbr.rel (%p1941_p12) target bundleno = 902 (0x386), region = 79  ;;  %s1968_s3 = sand.u32 (!%p1941_p12), 1, %s1817_s14  }
  0x2c   : > { %s1442_s22 = sshll.u32 (!%p1941_p12), %s1968_s3, 6 }
  0x2d   : > { %s381_s23 = scalar_lea.vmem (!%p1941_p12), [#allocation2], %s1442_s22 }
  0x30   : > { %1800 = dma.done.wait (%p1530_p11), [#allocation4], 512  }
  0x31   : > { %1802 = vsyncadd (%p1530_p11), [#allocation4], 4294966784 }
  0x32   : > { %1804 = dma.done.wait (%p1530_p11), [#allocation7], 512  }
  0x33   : > { %1806 = vsyncadd (%p1530_p11), [#allocation7], 4294966784  ;;  %v1831_v8 = vmov 0   ;;  %v432_v9 = vld [vmem:[%s381_s23 + $0x20] sm:$0xff]  ;;  %v433_v10 = vld [vmem:[%s381_s23 + $0x28] sm:$0xff]  ;;  %vm464_vm0 = vcmask 130048  }
  0x34   : > { %1572 = vset.pattern.permute.xlu0 %v1831_v8  ;;  %1573 = vset.pattern.permute.xlu1 %v1831_v8  ;;  %v434_v11 = vld [vmem:[%s381_s23 + $0x30] sm:$0xff]  ;;  %v435_v12 = vld [vmem:[%s381_s23 + $0x38] sm:$0xff]  ;;  %v428_v13 = vld [vmem:[%s381_s23] sm:$0xff]  ;;  %vm685_vm1 = vcmask 261120   ;;  %vm1225_vm2 = vcmask 64512   ;;  %s1508_s11 = sshll.u32 %s1908_s17, 5 }
  0x35   : > { %1574 = vset.pattern.permute.xlu2 %v1831_v8  ;;  %491 = vmatpush.msra.mxu0 %v432_v9  ;;  %v429_v14 = vld [vmem:[%s381_s23 + $0x8] sm:$0xff]  ;;  %v430_v15 = vld [vmem:[%s381_s23 + $0x10] sm:$0xff]  ;;  %v431_v16 = vld [vmem:[%s381_s23 + $0x18] sm:$0xff]  ;;  %s1445_s23 = sshll.u32 %s1968_s3, 5  ;;  %s1341_s27 = scalar_lea.hbm %s2148_s10, %s1508_s11 }
  0x36   : > { %520 = vmatpush.msra.mxu1 %v433_v10  ;;  %549 = vmatpush.msra.mxu2 %v434_v11  ;;  %v436_v17 = vld [vmem:[%s2139_s1] sm:$0xff]  ;;  %v443_v18 = vld [vmem:[%s2140_s2 + $0x18] sm:$0xff]  ;;  %v441_v19 = vld [vmem:[%s2140_s2 + $0x8] sm:$0xff]  ;;  %s425_s26 = scalar_lea.vmem [#allocation8], %s1445_s23  ;;  %s1345_s30 = sshll.u32 %s1341_s27, 4  ;;  %s1346_s30 = int_to_ptr.hbm [resolvable:$true] %s1345_s30 }
  0x37   : > { %578 = vmatpush.msra.mxu3 %v435_v12  ;;  %492 = vmatpush.msra.mxu0 %v428_v13  ;;  %v437_v20 = vld [vmem:[%s2139_s1 + $0x8] sm:$0xff]  ;;  %v442_v21 = vld [vmem:[%s2140_s2 + $0x10] sm:$0xff]  ;;  %v440_v22 = vld [vmem:[%s2140_s2] sm:$0xff]  ;;  %s1343_s28 = sshll.u32 %s425_s26, 4  ;;  %s1330_s17 = scalar_lea.sflag [#allocation5], %s1968_s3  ;;  %s1344_s28 = int_to_ptr.vmem [resolvable:$true] %s1343_s28 }
  0x38   : > { %521 = vmatpush.msra.mxu1 %v429_v14  ;;  %550 = vmatpush.msra.mxu2 %v430_v15  ;;  %v438_v23 = vld [vmem:[%s2139_s1 + $0x10] sm:$0xff]  ;;  %v662_v24 = vld [vmem:[%s2142_s4 + $0x8] sm:$0xff]  ;;  %v661_v25 = vld [vmem:[%s2142_s4] sm:$0xff]  ;;  %s1769_s12 = sshra.s32 %s1346_s30, 4  ;;  %s1775_s22 = scalar_lea.hbm %s2148_s10, 64  ;;  %s1770_s12 = int_to_ptr.hbm [resolvable:$true] %s1769_s12 }
  0x39   : > { %579 = vmatpush.msra.mxu3 %v431_v16  ;;  %1446 = vmatmul.msk.f32.vlgmr.msra.gmra.mxu0 %vm464_vm0, %v436_v17  ;;  %v439_v26 = vld [vmem:[%s2139_s1 + $0x18] sm:$0xff]  ;;  %v884_v27 = vld [vmem:[%s2144_s6 + $0x10] sm:$0xff]  ;;  %v883_v28 = vld [vmem:[%s2144_s6 + $0x8] sm:$0xff]  ;;  %s1771_s18 = scalar_lea.hbm %s1770_s12, 32  ;;  %p1776_p5 = scmp.lt.s32.totalorder %s1770_s12, %s2148_s10 }
  0x3a   : > { %1450 = vmatmul.msk.f32.vlgmr.msra.gmra.mxu1 %vm464_vm0, %v436_v17  ;;  %1454 = vmatmul.msk.f32.vlgmr.msra.gmra.mxu2 %vm464_vm0, %v436_v17  ;;  %v1099_v29 = vld [vmem:[%s2146_s8] sm:$0xff]  ;;  %p1772_p2 = scmp.ne.s32.totalorder %s1770_s12, %s1771_s18  ;;  %p1777_p7 = scmp.lt.s32.totalorder %s1775_s22, %s1771_s18 }
  0x3b   : > { %1458 = vmatmul.msk.f32.vlgmr.msra.gmra.mxu3 %vm464_vm0, %v436_v17  ;;  %461 = vperm.xlu0 %1572, %v443_v18  }
  0x3c   : > { %451 = vperm.xlu1 %1573, %v441_v19   ;;  %p1773_p3 = pnand %p1772_p2, %p1930_p6  ;;  %p1778_p8 = por %p1777_p7, %p1776_p5 }
  0x3e   : > { %p1774_p4 = pneg %p1773_p3 }
  0x40   : > { %p1779_p9 = pnand %p1778_p8, %p1774_p4 }
  0x41   : > { %1447 = vmatmul.msk.f32.gmra.mxu0 %vm464_vm0, %v437_v20 }
  0x42   : > { %1451 = vmatmul.msk.f32.gmra.mxu1 %vm464_vm0, %v437_v20  ;;  %1455 = vmatmul.msk.f32.gmra.mxu2 %vm464_vm0, %v437_v20 }
  0x43   : > { %1459 = vmatmul.msk.f32.gmra.mxu3 %vm464_vm0, %v437_v20  ;;  %456 = vperm.xlu0 %1572, %v442_v21  }
  0x44   : > { %446 = vperm.xlu1 %1573, %v440_v22  }
  0x49   : > { %1448 = vmatmul.msk.f32.gmra.mxu0 %vm464_vm0, %v438_v23 }
  0x4a   : > { %1452 = vmatmul.msk.f32.gmra.mxu1 %vm464_vm0, %v438_v23  ;;  %1456 = vmatmul.msk.f32.gmra.mxu2 %vm464_vm0, %v438_v23 }
  0x4b   : > { %1460 = vmatmul.msk.f32.gmra.mxu3 %vm464_vm0, %v438_v23  ;;  %672 = vperm.xlu0 %1572, %v662_v24  }
  0x4c   : > { %667 = vperm.xlu1 %1573, %v661_v25  }
  0x51   : > { %1449 = vmatmul.msk.f32.gmra.mxu0 %vm464_vm0, %v439_v26 }
  0x52   : > { %1453 = vmatmul.msk.f32.gmra.mxu1 %vm464_vm0, %v439_v26  ;;  %1457 = vmatmul.msk.f32.gmra.mxu2 %vm464_vm0, %v439_v26 }
  0x53   : > { %1461 = vmatmul.msk.f32.gmra.mxu3 %vm464_vm0, %v439_v26  ;;  %898 = vperm.xlu0 %1572, %v884_v27  }
  0x54   : > { %893 = vperm.xlu1 %1573, %v883_v28  }
  0x5b   : > { %1102 = vperm.xlu0 %1572, %v1099_v29  }
  0xad   : > { %v462_v36 = vpop.permute.xlu0 %461 }
  0xae   : > { %v452_v32 = vpop.permute.xlu1 %451 }
  0xb5   : > { %v457_v46 = vpop.permute.xlu0 %456 }
  0xb6   : > { %v494_v30 = vpop.f32.mrf.mxu0  ;;  %v447_v38 = vpop.permute.xlu1 %446 }
  0xb7   : > { %v523_v31 = vpop.f32.mrf.mxu1  ;;  %v495_v42 = vadd.f32 %v494_v30, %v447_v38 }
  0xb8   : > { %v524_v44 = vadd.f32 %v523_v31, %v447_v38 }
  0xb9   : > { %v593_v49 = vmul.f32 0.5, %v495_v42 }
  0xba   : > { %v594_v51 = vmul.f32 0.5, %v524_v44 }
  0xbb   : > { %1575 = vtanh.f32 %v593_v49 }
  0xbc   : > { %1577 = vtanh.f32 %v594_v51 }
  0xbd   : > { %v552_v33 = vpop.f32.mrf.mxu2 }
  0xbe   : > { %v581_v34 = vpop.f32.mrf.mxu3  ;;  %v497_v35 = vpop.f32.mrf.mxu0  ;;  %v553_v7 = vadd.f32 %v552_v33, %v447_v38 }
  0xbf   : > { %v526_v37 = vpop.f32.mrf.mxu1  ;;  %v498_v45 = vadd.f32 %v497_v35, %v452_v32  ;;  %v582_v10 = vadd.f32 %v581_v34, %v447_v38 }
  0xc0   : > { %v527_v47 = vadd.f32 %v526_v37, %v452_v32  ;;  %v595_v19 = vmul.f32 0.5, %v553_v7  ;;  %v885_v7 = vld [vmem:[%s2144_s6 + $0x18] sm:$0xff] }
  0xc1   : > { %v597_v52 = vmul.f32 0.5, %v498_v45  ;;  %v1576_v6 = vpop.eup %1575  ;;  %v596_v23 = vmul.f32 0.5, %v582_v10 }
  0xc2   : > { %v598_v53 = vmul.f32 0.5, %v527_v47  ;;  %v1578_v9 = vpop.eup %1577 }
  0xc3   : > { %1579 = vtanh.f32 %v597_v52 }
  0xc4   : > { %1581 = vtanh.f32 %v598_v53 }
  0xc5   : > { %v555_v39 = vpop.f32.mrf.mxu2 }
  0xc6   : > { %v584_v40 = vpop.f32.mrf.mxu3  ;;  %v500_v41 = vpop.f32.mrf.mxu0  ;;  %v556_v56 = vadd.f32 %v555_v39, %v452_v32 }
  0xc7   : > { %v529_v43 = vpop.f32.mrf.mxu1  ;;  %v501_v48 = vadd.f32 %v500_v41, %v457_v46  ;;  %v585_v59 = vadd.f32 %v584_v40, %v452_v32  ;;  %v625_v40 = vmul.f32 0.5, %v1576_v6  ;;  %v626_v41 = vmul.f32 0.5, %v1578_v9  ;;  %v659_v6 = vld [vmem:[#allocation3 + $0x10] sm:$0xff]  ;;  %v882_v9 = vld [vmem:[%s2144_s6] sm:$0xff] }
  0xc8   : > { %v530_v50 = vadd.f32 %v529_v43, %v457_v46  ;;  %v599_v3 = vmul.f32 0.5, %v556_v56  ;;  %v657_v56 = vld [vmem:[#allocation3] sm:$0xff] }
  0xc9   : > { %v601_v57 = vmul.f32 0.5, %v501_v48  ;;  %v600_v5 = vmul.f32 0.5, %v585_v59  ;;  %v1580_v14 = vpop.eup %1579  ;;  %v641_v52 = vadd.f32 0.5, %v625_v40  ;;  %v642_v53 = vadd.f32 0.5, %v626_v41 }
  0xca   : > { %v602_v60 = vmul.f32 0.5, %v530_v50  ;;  %v1582_v17 = vpop.eup %1581  ;;  %v629_v28 = vmul.f32 0.5, %v1580_v14 }
  0xcb   : > { %1583 = vtanh.f32 %v601_v57  ;;  %v630_v32 = vmul.f32 0.5, %v1582_v17 }
  0xcc   : > { %1585 = vtanh.f32 %v602_v60  ;;  %v645_v39 = vadd.f32 0.5, %v629_v28 }
  0xcd   : > { %v558_v54 = vpop.f32.mrf.mxu2  ;;  %v646_v44 = vadd.f32 0.5, %v630_v32 }
  0xce   : > { %v587_v55 = vpop.f32.mrf.mxu3  ;;  %v503_v58 = vpop.f32.mrf.mxu0  ;;  %v559_v63 = vadd.f32 %v558_v54, %v457_v46 }
  0xcf   : > { %v504_v61 = vadd.f32 %v503_v58, %v462_v36  ;;  %v532_v62 = vpop.f32.mrf.mxu1  ;;  %v588_v1 = vadd.f32 %v587_v55, %v457_v46 }
  0xd0   : > { %v533_v0 = vadd.f32 %v532_v62, %v462_v36  ;;  %v603_v8 = vmul.f32 0.5, %v559_v63  ;;  %v664_v63 = vld [vmem:[%s2142_s4 + $0x18] sm:$0xff] }
  0xd1   : > { %v605_v2 = vmul.f32 0.5, %v504_v61  ;;  %v604_v11 = vmul.f32 0.5, %v588_v1  ;;  %v1584_v18 = vpop.eup %1583  ;;  %682 = vperm.xlu2 %1574, %v664_v63  }
  0xd2   : > { %v606_v4 = vmul.f32 0.5, %v533_v0  ;;  %v1586_v22 = vpop.eup %1585  ;;  %v633_v27 = vmul.f32 0.5, %v1584_v18 }
  0xd3   : > { %1587 = vtanh.f32 %v605_v2  ;;  %v634_v31 = vmul.f32 0.5, %v1586_v22 }
  0xd4   : > { %1589 = vtanh.f32 %v606_v4  ;;  %v649_v38 = vadd.f32 0.5, %v633_v27  ;;  %v658_v4 = vld [vmem:[#allocation3 + $0x8] sm:$0xff] }
  0xd5   : > { %v561_v12 = vpop.f32.mrf.mxu2  ;;  %1591 = vtanh.f32 %v599_v3  ;;  %v650_v43 = vadd.f32 0.5, %v634_v31 }
  0xd6   : > { %v590_v13 = vpop.f32.mrf.mxu3  ;;  %v562_v15 = vadd.f32 %v561_v12, %v462_v36  ;;  %1593 = vtanh.f32 %v600_v5  ;;  %v663_v5 = vld [vmem:[%s2142_s4 + $0x10] sm:$0xff] }
  0xd7   : > { %v591_v16 = vadd.f32 %v590_v13, %v462_v36  ;;  %1595 = vtanh.f32 %v603_v8  ;;  %v660_v8 = vld [vmem:[#allocation3 + $0x18] sm:$0xff] }
  0xd8   : > { %v607_v20 = vmul.f32 0.5, %v562_v15  ;;  %1597 = vtanh.f32 %v604_v11 }
  0xd9   : > { %v608_v21 = vmul.f32 0.5, %v591_v16  ;;  %v1588_v24 = vpop.eup %1587  ;;  %677 = vperm.xlu2 %1574, %v663_v5  }
  0xda   : > { %1599 = vtanh.f32 %v607_v20  ;;  %v1590_v25 = vpop.eup %1589  ;;  %v637_v26 = vmul.f32 0.5, %v1588_v24  ;;  %v673_v20 = vpop.permute.xlu0 %672 }
  0xdb   : > { %1601 = vtanh.f32 %v608_v21  ;;  %v1592_v29 = vpop.eup %1591  ;;  %v638_v30 = vmul.f32 0.5, %v1590_v25 }
  0xdc   : > { %1603 = vtanh.f32 %v595_v19  ;;  %v1594_v33 = vpop.eup %1593  ;;  %v653_v34 = vadd.f32 0.5, %v637_v26  ;;  %v631_v57 = vmul.f32 0.5, %v1592_v29  ;;  %v668_v29 = vpop.permute.xlu1 %667 }
  0xdd   : > { %1605 = vtanh.f32 %v596_v23  ;;  %v1596_v35 = vpop.eup %1595  ;;  %v654_v36 = vadd.f32 0.5, %v638_v30  ;;  %v632_v58 = vmul.f32 0.5, %v1594_v33 }
  0xde   : > { %v1598_v37 = vpop.eup %1597  ;;  %710 = vmatpush.msrb.mxu0 %v653_v34  ;;  %v635_v49 = vmul.f32 0.5, %v1596_v35  ;;  %v647_v0 = vadd.f32 0.5, %v631_v57 }
  0xdf   : > { %739 = vmatpush.msrb.mxu1 %v654_v36  ;;  %v636_v50 = vmul.f32 0.5, %v1598_v37  ;;  %v648_v1 = vadd.f32 0.5, %v632_v58 }
  0xe0   : > { %v1600_v42 = vpop.eup %1599  ;;  %711 = vmatpush.msrb.mxu0 %v649_v38  ;;  %v651_v59 = vadd.f32 0.5, %v635_v49 }
  0xe1   : > { %v1602_v45 = vpop.eup %1601  ;;  %v639_v46 = vmul.f32 0.5, %v1600_v42  ;;  %740 = vmatpush.msrb.mxu1 %v650_v43  ;;  %v652_v60 = vadd.f32 0.5, %v636_v50  ;;  %903 = vperm.xlu2 %1574, %v885_v7  }
  0xe2   : > { %v1604_v47 = vpop.eup %1603  ;;  %v640_v48 = vmul.f32 0.5, %v1602_v45  ;;  %712 = vmatpush.msrb.mxu0 %v645_v39 }
  0xe3   : > { %v1606_v51 = vpop.eup %1605  ;;  %v655_v54 = vadd.f32 0.5, %v639_v46  ;;  %741 = vmatpush.msrb.mxu1 %v646_v44  ;;  %v627_v61 = vmul.f32 0.5, %v1604_v47 }
  0xe4   : > { %v656_v55 = vadd.f32 0.5, %v640_v48  ;;  %713 = vmatpush.msrb.mxu0 %v641_v52  ;;  %v628_v62 = vmul.f32 0.5, %v1606_v51 }
  0xe5   : > { %768 = vmatpush.msrb.mxu2 %v655_v54  ;;  %742 = vmatpush.msrb.mxu1 %v642_v53  ;;  %v643_v2 = vadd.f32 0.5, %v627_v61 }
  0xe6   : > { %797 = vmatpush.msrb.mxu3 %v656_v55  ;;  %1462 = vmatmul.msk.f32.vlgmr.msrb.gmra.mxu0 %vm685_vm1, %v657_v56  ;;  %v644_v3 = vadd.f32 0.5, %v628_v62 }
  0xe7   : > { %1466 = vmatmul.msk.f32.vlgmr.msrb.gmra.mxu1 %vm685_vm1, %v657_v56  ;;  %769 = vmatpush.msrb.mxu2 %v651_v59 }
  0xe8   : > { %798 = vmatpush.msrb.mxu3 %v652_v60 }
  0xe9   : > { %770 = vmatpush.msrb.mxu2 %v647_v0  ;;  %888 = vperm.xlu2 %1574, %v882_v9  }
  0xea   : > { %799 = vmatpush.msrb.mxu3 %v648_v1 }
  0xeb   : > { %771 = vmatpush.msrb.mxu2 %v643_v2 }
  0xec   : > { %800 = vmatpush.msrb.mxu3 %v644_v3  ;;  %1470 = vmatmul.msk.f32.vlgmr.msrb.gmra.mxu2 %vm685_vm1, %v657_v56 }
  0xed   : > { %1474 = vmatmul.msk.f32.vlgmr.msrb.gmra.mxu3 %vm685_vm1, %v657_v56 }
  0xee   : > { %1463 = vmatmul.msk.f32.gmra.mxu0 %vm685_vm1, %v658_v4 }
  0xef   : > { %1467 = vmatmul.msk.f32.gmra.mxu1 %vm685_vm1, %v658_v4 }
  0xf4   : > { %1471 = vmatmul.msk.f32.gmra.mxu2 %vm685_vm1, %v658_v4 }
  0xf5   : > { %1475 = vmatmul.msk.f32.gmra.mxu3 %vm685_vm1, %v658_v4 }
  0xf6   : > { %1464 = vmatmul.msk.f32.gmra.mxu0 %vm685_vm1, %v659_v6 }
  0xf7   : > { %1468 = vmatmul.msk.f32.gmra.mxu1 %vm685_vm1, %v659_v6 }
  0xfc   : > { %1472 = vmatmul.msk.f32.gmra.mxu2 %vm685_vm1, %v659_v6 }
  0xfd   : > { %1476 = vmatmul.msk.f32.gmra.mxu3 %vm685_vm1, %v659_v6 }
  0xfe   : > { %1465 = vmatmul.msk.f32.gmra.mxu0 %vm685_vm1, %v660_v8 }
  0xff   : > { %1469 = vmatmul.msk.f32.gmra.mxu1 %vm685_vm1, %v660_v8 }
 0x104   : > { %1473 = vmatmul.msk.f32.gmra.mxu2 %vm685_vm1, %v660_v8 }
 0x105   : > { %1477 = vmatmul.msk.f32.gmra.mxu3 %vm685_vm1, %v660_v8 }
 0x12b   : > { %v2062_v12 = vpop.permute.xlu2 %682 }
 0x133   : > { %v678_v17 = vpop.permute.xlu2 %677 }
 0x163   : > { %v715_v10 = vpop.f32.mrf.mxu0 }
 0x164   : > { %v744_v11 = vpop.f32.mrf.mxu1  ;;  %v716_v31 = vadd.f32 %v715_v10, %v668_v29 }
 0x165   : > { %v745_v33 = vadd.f32 %v744_v11, %v668_v29 }
 0x166   : > { %v814_v38 = vmul.f32 0.5, %v716_v31 }
 0x167   : > { %v815_v41 = vmul.f32 0.5, %v745_v33 }
 0x16b   : > { %v718_v13 = vpop.f32.mrf.mxu0 }
 0x16c   : > { %v747_v14 = vpop.f32.mrf.mxu1  ;;  %v719_v23 = vadd.f32 %v718_v13, %v673_v20 }
 0x16d   : > { %v748_v24 = vadd.f32 %v747_v14, %v673_v20 }
 0x16e   : > { %v818_v30 = vmul.f32 0.5, %v719_v23  ;;  %v878_v23 = vld [vmem:[#allocation6] sm:$0xff] }
 0x16f   : > { %v773_v15 = vpop.f32.mrf.mxu2  ;;  %v819_v32 = vmul.f32 0.5, %v748_v24 }
 0x170   : > { %v802_v16 = vpop.f32.mrf.mxu3  ;;  %v774_v48 = vadd.f32 %v773_v15, %v668_v29 }
 0x171   : > { %v803_v59 = vadd.f32 %v802_v16, %v668_v29 }
 0x172   : > { %v816_v58 = vmul.f32 0.5, %v774_v48  ;;  %v880_v48 = vld [vmem:[#allocation6 + $0x10] sm:$0xff] }
 0x173   : > { %v721_v18 = vpop.f32.mrf.mxu0 }
 0x174   : > { %v750_v19 = vpop.f32.mrf.mxu1  ;;  %v722_v21 = vadd.f32 %v721_v18, %v678_v17 }
 0x175   : > { %v751_v22 = vadd.f32 %v750_v19, %v678_v17 }
 0x176   : > { %v822_v25 = vmul.f32 0.5, %v722_v21 }
 0x177   : > { %v776_v26 = vpop.f32.mrf.mxu2  ;;  %v823_v28 = vmul.f32 0.5, %v751_v22 }
 0x178   : > { %v805_v27 = vpop.f32.mrf.mxu3  ;;  %1607 = vtanh.f32 %v822_v25  ;;  %v777_v44 = vadd.f32 %v776_v26, %v673_v20 }
 0x179   : > { %1609 = vtanh.f32 %v823_v28  ;;  %v806_v46 = vadd.f32 %v805_v27, %v673_v20 }
 0x17a   : > { %1611 = vtanh.f32 %v818_v30  ;;  %v820_v53 = vmul.f32 0.5, %v777_v44 }
 0x17b   : > { %v724_v34 = vpop.f32.mrf.mxu0  ;;  %1613 = vtanh.f32 %v819_v32  ;;  %v821_v56 = vmul.f32 0.5, %v806_v46 }
 0x17c   : > { %v753_v35 = vpop.f32.mrf.mxu1  ;;  %v725_v36 = vadd.f32 %v724_v34, %v2062_v12 }
 0x17d   : > { %v754_v37 = vadd.f32 %v753_v35, %v2062_v12 }
 0x17e   : > { %v826_v39 = vmul.f32 0.5, %v725_v36  ;;  %v1608_v45 = vpop.eup %1607 }
 0x17f   : > { %v827_v40 = vmul.f32 0.5, %v754_v37  ;;  %v779_v42 = vpop.f32.mrf.mxu2  ;;  %v1610_v47 = vpop.eup %1609  ;;  %v854_v54 = vmul.f32 0.5, %v1608_v45 }
 0x180   : > { %v808_v43 = vpop.f32.mrf.mxu3  ;;  %1615 = vtanh.f32 %v826_v39  ;;  %v780_v49 = vadd.f32 %v779_v42, %v678_v17  ;;  %v1612_v50 = vpop.eup %1611  ;;  %v855_v55 = vmul.f32 0.5, %v1610_v47 }
 0x181   : > { %1617 = vtanh.f32 %v827_v40  ;;  %v809_v51 = vadd.f32 %v808_v43, %v678_v17  ;;  %v1614_v52 = vpop.eup %1613  ;;  %v850_v62 = vmul.f32 0.5, %v1612_v50  ;;  %v870_v9 = vadd.f32 0.5, %v854_v54  ;;  %v2084_v54 = vpop.permute.xlu2 %903 }
 0x182   : > { %1619 = vtanh.f32 %v814_v38  ;;  %v824_v60 = vmul.f32 0.5, %v780_v49  ;;  %v851_v63 = vmul.f32 0.5, %v1614_v52  ;;  %v871_v10 = vadd.f32 0.5, %v855_v55  ;;  %v881_v49 = vld [vmem:[#allocation6 + $0x18] sm:$0xff]  ;;  %v894_v55 = vpop.permute.xlu1 %893 }
 0x183   : > { %1621 = vtanh.f32 %v815_v41  ;;  %v825_v1 = vmul.f32 0.5, %v809_v51  ;;  %v817_v17 = vmul.f32 0.5, %v803_v59  ;;  %v866_v19 = vadd.f32 0.5, %v850_v62  ;;  %v879_v41 = vld [vmem:[#allocation6 + $0x8] sm:$0xff]  ;;  %v899_v59 = vpop.permute.xlu0 %898 }
 0x184   : > { %1623 = vtanh.f32 %v820_v53  ;;  %v867_v20 = vadd.f32 0.5, %v851_v63 }
 0x185   : > { %1625 = vtanh.f32 %v821_v56 }
 0x186   : > { %v1616_v57 = vpop.eup %1615  ;;  %1627 = vtanh.f32 %v824_v60 }
 0x187   : > { %v1618_v61 = vpop.eup %1617  ;;  %v858_v0 = vmul.f32 0.5, %v1616_v57  ;;  %v782_v2 = vpop.f32.mrf.mxu2  ;;  %1629 = vtanh.f32 %v825_v1 }
 0x188   : > { %v811_v3 = vpop.f32.mrf.mxu3  ;;  %v1620_v4 = vpop.eup %1619  ;;  %v859_v5 = vmul.f32 0.5, %v1618_v61  ;;  %v783_v6 = vadd.f32 %v782_v2, %v2062_v12 }
 0x189   : > { %v812_v7 = vadd.f32 %v811_v3, %v2062_v12  ;;  %v1622_v8 = vpop.eup %1621  ;;  %v874_v11 = vadd.f32 0.5, %v858_v0  ;;  %v846_v16 = vmul.f32 0.5, %v1620_v4  ;;  %v889_v2 = vpop.permute.xlu2 %888 }
 0x18a   : > { %v875_v13 = vadd.f32 0.5, %v859_v5  ;;  %v828_v14 = vmul.f32 0.5, %v783_v6  ;;  %v847_v18 = vmul.f32 0.5, %v1622_v8  ;;  %v1624_v12 = vpop.eup %1623 }
 0x18b   : > { %v829_v15 = vmul.f32 0.5, %v812_v7  ;;  %930 = vmatpush.msra.mxu0 %v874_v11  ;;  %v1626_v21 = vpop.eup %1625  ;;  %v862_v22 = vadd.f32 0.5, %v846_v16  ;;  %v852_v35 = vmul.f32 0.5, %v1624_v12 }
 0x18c   : > { %1631 = vtanh.f32 %v828_v14  ;;  %959 = vmatpush.msra.mxu1 %v875_v13  ;;  %v1628_v24 = vpop.eup %1627  ;;  %v863_v25 = vadd.f32 0.5, %v847_v18  ;;  %v853_v37 = vmul.f32 0.5, %v1626_v21 }
 0x18d   : > { %1633 = vtanh.f32 %v829_v15  ;;  %931 = vmatpush.msra.mxu0 %v870_v9  ;;  %v1630_v26 = vpop.eup %1629  ;;  %v856_v29 = vmul.f32 0.5, %v1628_v24  ;;  %v868_v44 = vadd.f32 0.5, %v852_v35 }
 0x18e   : > { %1635 = vtanh.f32 %v816_v58  ;;  %960 = vmatpush.msra.mxu1 %v871_v10  ;;  %v857_v32 = vmul.f32 0.5, %v1630_v26  ;;  %v869_v45 = vadd.f32 0.5, %v853_v37 }
 0x18f   : > { %1637 = vtanh.f32 %v817_v17  ;;  %932 = vmatpush.msra.mxu0 %v866_v19  ;;  %v872_v40 = vadd.f32 0.5, %v856_v29 }
 0x190   : > { %961 = vmatpush.msra.mxu1 %v867_v20  ;;  %v873_v43 = vadd.f32 0.5, %v857_v32 }
 0x191   : > { %933 = vmatpush.msra.mxu0 %v862_v22 }
 0x192   : > { %v1632_v27 = vpop.eup %1631  ;;  %962 = vmatpush.msra.mxu1 %v863_v25  ;;  %1478 = vmatmul.msk.f32.vlgmr.msra.gmra.mxu0 %vm685_vm1, %v878_v23 }
 0x193   : > { %v1634_v28 = vpop.eup %1633  ;;  %v860_v30 = vmul.f32 0.5, %v1632_v27  ;;  %1482 = vmatmul.msk.f32.vlgmr.msra.gmra.mxu1 %vm685_vm1, %v878_v23 }
 0x194   : > { %v1636_v31 = vpop.eup %1635  ;;  %v861_v33 = vmul.f32 0.5, %v1634_v28 }
 0x195   : > { %v1638_v34 = vpop.eup %1637  ;;  %v876_v36 = vadd.f32 0.5, %v860_v30  ;;  %v848_v39 = vmul.f32 0.5, %v1636_v31 }
 0x196   : > { %v877_v38 = vadd.f32 0.5, %v861_v33  ;;  %v849_v42 = vmul.f32 0.5, %v1638_v34 }
 0x197   : > { %988 = vmatpush.msra.mxu2 %v876_v36  ;;  %v864_v46 = vadd.f32 0.5, %v848_v39 }
 0x198   : > { %1017 = vmatpush.msra.mxu3 %v877_v38  ;;  %v865_v47 = vadd.f32 0.5, %v849_v42 }
 0x199   : > { %989 = vmatpush.msra.mxu2 %v872_v40 }
 0x19a   : > { %1018 = vmatpush.msra.mxu3 %v873_v43  ;;  %1479 = vmatmul.msk.f32.gmra.mxu0 %vm685_vm1, %v879_v41 }
 0x19b   : > { %1483 = vmatmul.msk.f32.gmra.mxu1 %vm685_vm1, %v879_v41  ;;  %990 = vmatpush.msra.mxu2 %v868_v44 }
 0x19c   : > { %1019 = vmatpush.msra.mxu3 %v869_v45 }
 0x19d   : > { %991 = vmatpush.msra.mxu2 %v864_v46 }
 0x19e   : > { %1020 = vmatpush.msra.mxu3 %v865_v47  ;;  %1486 = vmatmul.msk.f32.vlgmr.msra.gmra.mxu2 %vm685_vm1, %v878_v23 }
 0x19f   : > { %1490 = vmatmul.msk.f32.vlgmr.msra.gmra.mxu3 %vm685_vm1, %v878_v23 }
 0x1a2   : > { %1480 = vmatmul.msk.f32.gmra.mxu0 %vm685_vm1, %v880_v48 }
 0x1a3   : > { %1484 = vmatmul.msk.f32.gmra.mxu1 %vm685_vm1, %v880_v48 }
 0x1a6   : > { %1487 = vmatmul.msk.f32.gmra.mxu2 %vm685_vm1, %v879_v41 }
 0x1a7   : > { %1491 = vmatmul.msk.f32.gmra.mxu3 %vm685_vm1, %v879_v41 }
 0x1aa   : > { %1481 = vmatmul.msk.f32.gmra.mxu0 %vm685_vm1, %v881_v49 }
 0x1ab   : > { %1485 = vmatmul.msk.f32.gmra.mxu1 %vm685_vm1, %v881_v49 }
 0x1ae   : > { %1488 = vmatmul.msk.f32.gmra.mxu2 %vm685_vm1, %v880_v48 }
 0x1af   : > { %1492 = vmatmul.msk.f32.gmra.mxu3 %vm685_vm1, %v880_v48 }
 0x1b6   : > { %1489 = vmatmul.msk.f32.gmra.mxu2 %vm685_vm1, %v881_v49 }
 0x1b7   : > { %1493 = vmatmul.msk.f32.gmra.mxu3 %vm685_vm1, %v881_v49 }
 0x20f   : > { %v935_v50 = vpop.f32.mrf.mxu0 }
 0x210   : > { %v964_v51 = vpop.f32.mrf.mxu1  ;;  %v936_v4 = vadd.f32 %v935_v50, %v889_v2 }
 0x211   : > { %v965_v6 = vadd.f32 %v964_v51, %v889_v2 }
 0x212   : > { %v1034_v14 = vmul.f32 0.5, %v936_v4 }
 0x213   : > { %v1035_v17 = vmul.f32 0.5, %v965_v6 }
 0x217   : > { %v938_v52 = vpop.f32.mrf.mxu0 }
 0x218   : > { %v967_v53 = vpop.f32.mrf.mxu1  ;;  %v939_v57 = vadd.f32 %v938_v52, %v894_v55 }
 0x219   : > { %v968_v60 = vadd.f32 %v967_v53, %v894_v55 }
 0x21a   : > { %v1038_v1 = vmul.f32 0.5, %v939_v57 }
 0x21b   : > { %v1039_v3 = vmul.f32 0.5, %v968_v60 }
 0x21c   : > { %1639 = vtanh.f32 %v1038_v1 }
 0x21d   : > { %1641 = vtanh.f32 %v1039_v3 }
 0x21f   : > { %v941_v56 = vpop.f32.mrf.mxu0 }
 0x220   : > { %v970_v58 = vpop.f32.mrf.mxu1  ;;  %v942_v62 = vadd.f32 %v941_v56, %v899_v59 }
 0x221   : > { %v993_v61 = vpop.f32.mrf.mxu2  ;;  %v971_v0 = vadd.f32 %v970_v58, %v899_v59  ;;  %v1098_v58 = vld [vmem:[%s2145_s7] sm:$0xff] }
 0x222   : > { %v1022_v63 = vpop.f32.mrf.mxu3  ;;  %v1042_v5 = vmul.f32 0.5, %v942_v62  ;;  %v1640_v19 = vpop.eup %1639  ;;  %v994_v46 = vadd.f32 %v993_v61, %v889_v2 }
 0x223   : > { %v1043_v7 = vmul.f32 0.5, %v971_v0  ;;  %v1642_v12 = vpop.eup %1641  ;;  %v1070_v35 = vmul.f32 0.5, %v1640_v19  ;;  %v1023_v49 = vadd.f32 %v1022_v63, %v889_v2 }
 0x224   : > { %1643 = vtanh.f32 %v1042_v5  ;;  %v1071_v38 = vmul.f32 0.5, %v1642_v12  ;;  %v1036_v60 = vmul.f32 0.5, %v994_v46 }
 0x225   : > { %1645 = vtanh.f32 %v1043_v7  ;;  %v1086_v48 = vadd.f32 0.5, %v1070_v35  ;;  %v1037_v62 = vmul.f32 0.5, %v1023_v49 }
 0x226   : > { %v1087_v52 = vadd.f32 0.5, %v1071_v38 }
 0x227   : > { %v944_v8 = vpop.f32.mrf.mxu0 }
 0x228   : > { %v945_v9 = vadd.f32 %v944_v8, %v2084_v54  ;;  %v973_v10 = vpop.f32.mrf.mxu1 }
 0x229   : > { %v974_v11 = vadd.f32 %v973_v10, %v2084_v54  ;;  %v996_v13 = vpop.f32.mrf.mxu2 }
 0x22a   : > { %v1046_v15 = vmul.f32 0.5, %v945_v9  ;;  %v1025_v16 = vpop.f32.mrf.mxu3  ;;  %v1644_v20 = vpop.eup %1643  ;;  %v997_v24 = vadd.f32 %v996_v13, %v894_v55 }
 0x22b   : > { %v1047_v18 = vmul.f32 0.5, %v974_v11  ;;  %v1646_v21 = vpop.eup %1645  ;;  %v1074_v27 = vmul.f32 0.5, %v1644_v20  ;;  %v1026_v29 = vadd.f32 %v1025_v16, %v894_v55 }
 0x22c   : > { %1647 = vtanh.f32 %v1046_v15  ;;  %v1075_v31 = vmul.f32 0.5, %v1646_v21  ;;  %v1040_v40 = vmul.f32 0.5, %v997_v24 }
 0x22d   : > { %1649 = vtanh.f32 %v1047_v18  ;;  %v1090_v42 = vadd.f32 0.5, %v1074_v27  ;;  %v1041_v43 = vmul.f32 0.5, %v1026_v29 }
 0x22e   : > { %1651 = vtanh.f32 %v1034_v14  ;;  %v1091_v45 = vadd.f32 0.5, %v1075_v31 }
 0x22f   : > { %1653 = vtanh.f32 %v1035_v17 }
 0x230   : > { %1655 = vtanh.f32 %v1040_v40 }
 0x231   : > { %v999_v22 = vpop.f32.mrf.mxu2  ;;  %1657 = vtanh.f32 %v1041_v43 }
 0x232   : > { %v1648_v23 = vpop.eup %1647  ;;  %v1028_v25 = vpop.f32.mrf.mxu3  ;;  %v1000_v33 = vadd.f32 %v999_v22, %v899_v59 }
 0x233   : > { %v1650_v26 = vpop.eup %1649  ;;  %v1078_v28 = vmul.f32 0.5, %v1648_v23  ;;  %v1029_v37 = vadd.f32 %v1028_v25, %v899_v59  ;;  %v1103_v23 = vpop.permute.xlu0 %1102 }
 0x234   : > { %v1652_v30 = vpop.eup %1651  ;;  %v1079_v32 = vmul.f32 0.5, %v1650_v26  ;;  %v1044_v47 = vmul.f32 0.5, %v1000_v33 }
 0x235   : > { %v1654_v34 = vpop.eup %1653  ;;  %v1094_v36 = vadd.f32 0.5, %v1078_v28  ;;  %v1066_v41 = vmul.f32 0.5, %v1652_v30  ;;  %v1045_v50 = vmul.f32 0.5, %v1029_v37 }
 0x236   : > { %v1095_v39 = vadd.f32 0.5, %v1079_v32  ;;  %v1067_v44 = vmul.f32 0.5, %v1654_v34  ;;  %1659 = vtanh.f32 %v1044_v47 }
 0x237   : > { %1120 = vmatpush.msrb.mxu0 %v1094_v36  ;;  %v1082_v56 = vadd.f32 0.5, %v1066_v41  ;;  %1661 = vtanh.f32 %v1045_v50 }
 0x238   : > { %1140 = vmatpush.msrb.mxu1 %v1095_v39  ;;  %v1083_v59 = vadd.f32 0.5, %v1067_v44 }
 0x239   : > { %v1002_v51 = vpop.f32.mrf.mxu2  ;;  %1121 = vmatpush.msrb.mxu0 %v1090_v42 }
 0x23a   : > { %v1003_v53 = vadd.f32 %v1002_v51, %v2084_v54  ;;  %v1031_v55 = vpop.f32.mrf.mxu3  ;;  %1141 = vmatpush.msrb.mxu1 %v1091_v45 }
 0x23b   : > { %v1032_v57 = vadd.f32 %v1031_v55, %v2084_v54  ;;  %1122 = vmatpush.msrb.mxu0 %v1086_v48  ;;  %v1656_v54 = vpop.eup %1655  ;;  %v1224_v48 = vld [vmem:[%s2147_s9] sm:$0xff] }
 0x23c   : > { %v1048_v61 = vmul.f32 0.5, %v1003_v53  ;;  %1142 = vmatpush.msrb.mxu1 %v1087_v52  ;;  %v1658_v0 = vpop.eup %1657  ;;  %v1072_v11 = vmul.f32 0.5, %v1656_v54 }
 0x23d   : > { %v1049_v63 = vmul.f32 0.5, %v1032_v57  ;;  %1123 = vmatpush.msrb.mxu0 %v1082_v56  ;;  %v1660_v1 = vpop.eup %1659  ;;  %v1073_v14 = vmul.f32 0.5, %v1658_v0 }
 0x23e   : > { %1663 = vtanh.f32 %v1048_v61  ;;  %1143 = vmatpush.msrb.mxu1 %v1083_v59  ;;  %1494 = vmatmul.msk.f32.vlgmr.msrb.gmra.mxu0 %vm685_vm1, %v1098_v58  ;;  %v1662_v2 = vpop.eup %1661  ;;  %v1076_v5 = vmul.f32 0.5, %v1660_v1  ;;  %v1088_v12 = vadd.f32 0.5, %v1072_v11 }
 0x23f   : > { %1665 = vtanh.f32 %v1049_v63  ;;  %1495 = vmatmul.msk.f32.vlgmr.msrb.gmra.mxu1 %vm685_vm1, %v1098_v58  ;;  %v1077_v8 = vmul.f32 0.5, %v1662_v2  ;;  %v1089_v20 = vadd.f32 0.5, %v1073_v14 }
 0x240   : > { %1667 = vtanh.f32 %v1036_v60  ;;  %v1092_v17 = vadd.f32 0.5, %v1076_v5 }
 0x241   : > { %1669 = vtanh.f32 %v1037_v62  ;;  %v1093_v19 = vadd.f32 0.5, %v1077_v8 }
 0x244   : > { %v1664_v3 = vpop.eup %1663 }
 0x245   : > { %v1666_v4 = vpop.eup %1665  ;;  %v1080_v6 = vmul.f32 0.5, %v1664_v3 }
 0x246   : > { %v1668_v7 = vpop.eup %1667  ;;  %v1081_v9 = vmul.f32 0.5, %v1666_v4 }
 0x247   : > { %v1670_v10 = vpop.eup %1669  ;;  %v1096_v13 = vadd.f32 0.5, %v1080_v6  ;;  %v1068_v16 = vmul.f32 0.5, %v1668_v7 }
 0x248   : > { %v1097_v15 = vadd.f32 0.5, %v1081_v9  ;;  %v1069_v18 = vmul.f32 0.5, %v1670_v10 }
 0x249   : > { %1160 = vmatpush.msrb.mxu2 %v1096_v13  ;;  %v1084_v21 = vadd.f32 0.5, %v1068_v16 }
 0x24a   : > { %1180 = vmatpush.msrb.mxu3 %v1097_v15  ;;  %v1085_v22 = vadd.f32 0.5, %v1069_v18 }
 0x24b   : > { %1161 = vmatpush.msrb.mxu2 %v1092_v17 }
 0x24c   : > { %1181 = vmatpush.msrb.mxu3 %v1093_v19 }
 0x24d   : > { %1162 = vmatpush.msrb.mxu2 %v1088_v12 }
 0x24e   : > { %1182 = vmatpush.msrb.mxu3 %v1089_v20 }
 0x24f   : > { %1163 = vmatpush.msrb.mxu2 %v1084_v21 }
 0x250   : > { %1183 = vmatpush.msrb.mxu3 %v1085_v22  ;;  %1496 = vmatmul.msk.f32.vlgmr.msrb.gmra.mxu2 %vm685_vm1, %v1098_v58 }
 0x251   : > { %1497 = vmatmul.msk.f32.vlgmr.msrb.gmra.mxu3 %vm685_vm1, %v1098_v58 }
 0x2bb   : > { %v1125_v24 = vpop.f32.mrf.mxu0 }
 0x2bc   : > { %v1126_v25 = vadd.f32 %v1125_v24, %v1103_v23  ;;  %v1145_v26 = vpop.f32.mrf.mxu1 }
 0x2bd   : > { %v1146_v27 = vadd.f32 %v1145_v26, %v1103_v23 }
 0x2be   : > { %v1188_v28 = vmin.f32 %v1126_v25, 12.0 }
 0x2bf   : > { %v1189_v29 = vmin.f32 %v1146_v27, 12.0 }
 0x2c0   : > { %v1192_v30 = vmul.f32 0.5, %v1188_v28 }
 0x2c1   : > { %v1193_v31 = vmul.f32 0.5, %v1189_v29 }
 0x2c2   : > { %1671 = vtanh.f32 %v1192_v30 }
 0x2c3   : > { %1673 = vtanh.f32 %v1193_v31 }
 0x2c8   : > { %v1672_v32 = vpop.eup %1671 }
 0x2c9   : > { %v1674_v33 = vpop.eup %1673  ;;  %v1200_v34 = vmul.f32 0.5, %v1672_v32 }
 0x2ca   : > { %v1201_v35 = vmul.f32 0.5, %v1674_v33 }
 0x2cb   : > { %v1208_v36 = vsub.f32 0.5, %v1200_v34  ;;  %v1204_v7 = vadd.f32 0.5, %v1200_v34 }
 0x2cc   : > { %v1209_v37 = vsub.f32 0.5, %v1201_v35  ;;  %v1205_v9 = vadd.f32 0.5, %v1201_v35 }
 0x2cd   : > { %1675 = vlog2.f32 %v1208_v36 }
 0x2ce   : > { %1677 = vlog2.f32 %v1209_v37 }
 0x2d3   : > { %v1676_v38 = vpop.eup %1675  ;;  %v1165_v39 = vpop.f32.mrf.mxu2 }
 0x2d4   : > { %v1678_v40 = vpop.eup %1677  ;;  %v1166_v41 = vadd.f32 %v1165_v39, %v1103_v23  ;;  %v1185_v42 = vpop.f32.mrf.mxu3  ;;  %v1213_v43 = vmul.f32 0.6931472, %v1676_v38 }
 0x2d5   : > { %v1186_v44 = vadd.f32 %v1185_v42, %v1103_v23  ;;  %v1215_v45 = vmul.f32 0.6931472, %v1678_v40 }
 0x2d6   : > { %v1190_v46 = vmin.f32 %v1166_v41, 12.0  ;;  %v1220_v47 = vsub.f32 0.0, %v1213_v43 }
 0x2d7   : > { %v1191_v49 = vmin.f32 %v1186_v44, 12.0  ;;  %v1221_v50 = vsub.f32 0.0, %v1215_v45 }
 0x2d8   : > { %v1194_v51 = vmul.f32 0.5, %v1190_v46  ;;  %1244 = vmatpush.msra.mxu0 %v1220_v47 }
 0x2d9   : > { %v1195_v52 = vmul.f32 0.5, %v1191_v49  ;;  %1264 = vmatpush.msra.mxu1 %v1221_v50  ;;  %1498 = vmatmul.msk.f32.vlgmr.msra.gmra.mxu0 %vm1225_vm2, %v1224_v48 }
 0x2da   : > { %1679 = vtanh.f32 %v1194_v51  ;;  %1499 = vmatmul.msk.f32.vlgmr.msra.gmra.mxu1 %vm1225_vm2, %v1224_v48 }
 0x2db   : > { %1681 = vtanh.f32 %v1195_v52 }
 0x2e0   : > { %v1680_v53 = vpop.eup %1679 }
 0x2e1   : > { %v1682_v55 = vpop.eup %1681  ;;  %v1202_v56 = vmul.f32 0.5, %v1680_v53 }
 0x2e2   : > { %v1203_v57 = vmul.f32 0.5, %v1682_v55 }
 0x2e3   : > { %v1210_v58 = vsub.f32 0.5, %v1202_v56  ;;  %v1206_v12 = vadd.f32 0.5, %v1202_v56 }
 0x2e4   : > { %v1211_v59 = vsub.f32 0.5, %v1203_v57  ;;  %v1207_v21 = vadd.f32 0.5, %v1203_v57 }
 0x2e5   : > { %1683 = vlog2.f32 %v1210_v58 }
 0x2e6   : > { %1685 = vlog2.f32 %v1211_v59 }
 0x2eb   : > { %v1684_v60 = vpop.eup %1683 }
 0x2ec   : > { %v1686_v61 = vpop.eup %1685  ;;  %v1217_v62 = vmul.f32 0.6931472, %v1684_v60 }
 0x2ed   : > { %v1219_v63 = vmul.f32 0.6931472, %v1686_v61 }
 0x2ee   : > { %v1222_v54 = vsub.f32 0.0, %v1217_v62 }
 0x2ef   : > { %v1223_v0 = vsub.f32 0.0, %v1219_v63 }
 0x2f0   : > { %1284 = vmatpush.msra.mxu2 %v1222_v54 }
 0x2f1   : > { %1304 = vmatpush.msra.mxu3 %v1223_v0  ;;  %1500 = vmatmul.msk.f32.vlgmr.msra.gmra.mxu2 %vm1225_vm2, %v1224_v48 }
 0x2f2   : > { %1501 = vmatmul.msk.f32.vlgmr.msra.gmra.mxu3 %vm1225_vm2, %v1224_v48 }
 0x356   : > { %v1246_v1 = vpop.f32.mrf.mxu0 }
 0x357   : > { %v1309_v2 = vsub.f32 0.0, %v1246_v1  ;;  %v1266_v3 = vpop.f32.mrf.mxu1 }
 0x358   : > { %v1310_v4 = vsub.f32 0.0, %v1266_v3 }
 0x359   : > { %v1313_v5 = vmul.f32 1.442695, %v1309_v2 }
 0x35a   : > { %v1315_v6 = vmul.f32 1.442695, %v1310_v4 }
 0x35b   : > { %1687 = vpow2.f32 %v1313_v5 }
 0x35c   : > { %1689 = vpow2.f32 %v1315_v6 }
 0x361   : > { %v1688_v8 = vpop.eup %1687 }
 0x362   : > { %v1690_v10 = vpop.eup %1689  ;;  %v1321_v11 = vmul.f32 %v1688_v8, %v1204_v7 }
 0x363   : > { %v1322_v13 = vmul.f32 %v1690_v10, %v1205_v9 }
 0x364   : > { %1325 = vst [vmem:[%s425_s26] sm:$0xff] %v1321_v11 }
 0x365   : > { %1326 = vst [vmem:[%s425_s26 + $0x8] sm:$0xff] %v1322_v13 }
 0x374   : > { %v1286_v14 = vpop.f32.mrf.mxu2 }
 0x375   : > { %v1311_v15 = vsub.f32 0.0, %v1286_v14  ;;  %v1306_v16 = vpop.f32.mrf.mxu3 }
 0x376   : > { %v1312_v17 = vsub.f32 0.0, %v1306_v16 }
 0x377   : > { %v1317_v18 = vmul.f32 1.442695, %v1311_v15 }
 0x378   : > { %v1319_v19 = vmul.f32 1.442695, %v1312_v17 }
 0x379   : > { %1691 = vpow2.f32 %v1317_v18 }
 0x37a   : > { %1693 = vpow2.f32 %v1319_v19 }
 0x37f   : > { %v1692_v20 = vpop.eup %1691 }
 0x380   : > { %v1694_v22 = vpop.eup %1693  ;;  %v1323_v23 = vmul.f32 %v1692_v20, %v1206_v12 }
 0x381   : > { %v1324_v24 = vmul.f32 %v1694_v22, %v1207_v21 }
 0x382   : > { %1327 = vst [vmem:[%s425_s26 + $0x10] sm:$0xff] %v1323_v23 }
 0x383   : > { %1328 = vst [vmem:[%s425_s26 + $0x18] sm:$0xff] %v1324_v24 }
 0x384   : > { %1782 = shalt.err (!%p1779_p9)
}
 0x385   : > { %1517 = dma.vmem_to_hbm [thread:$0]  (%p1930_p6), %s1344_s28, 512, %s1346_s30, %s1330_s17  }
 0x386 PF: > { %s1357_s3 = sand.u32 1, %s1813_s13   ;;  %p1527_p11 = pnand %p1437_p1, %p1936_p10 }
 0x387   : > { %s1358_s26 = scalar_lea.sflag [#allocation5], %s1357_s3 }
 0x388   : > { %p1528_p12 = pneg %p1527_p11 }
 0x38a   : > { %1808 = dma.done.wait (%p1528_p12), %s1358_s26, 512  }
 0x38b   : > { %1810 = vsyncadd (%p1528_p12), %s1358_s26, 4294966784  ;;  %s2159_s16 = sld [smem:[#allocation12_spill]]  ;;  %s2161_s13 = smov %s1817_s14 }
 0x38c   : > { %s2160_s20 = sld [smem:[#allocation13_spill]]  ;;  %s2162_s14 = smov %s1821_s15 }
 0x391   : > { %p22_p13 = scmp.ge.s32.totalorder %s2159_s16, 4  }
 0x392   : > { %s2163_s15 = smov %s2160_s20 }
 0x393   :  { %24 = sbr.rel (!%p22_p13) target bundleno = 7 (0x7), region = 132 }
 0x398   :  { %1364 = vsyncpa [#allocation4], 1 }
 0x399   :  { %1366 = vsyncpa [#allocation4 + $0x1], 1 }
 0x39a   :  { %1367 = vsyncpa [#allocation7], 1 }
 0x39b   :  { %1368 = vsyncpa [#allocation5], 1 }
 0x39c   :  { %1370 = vsyncpa [#allocation5 + $0x1], 1 }

</bundles_post_ra>
